<compile_context>
chip_gen: v7x
topology: tpu7x:2x2x1
jax: 0.10.0
libtpu: 0.0.40
codegen_flags: <defaults>
</compile_context>

<pallas_src>
import functools

import jax
import jax.numpy as jnp
from jax.experimental import pallas as pl
from jax.experimental.pallas import tpu as pltpu


def _recon_kernel(x_ref, w1_ref, b1_ref, w2_ref, b2_ref, w3_ref, b3_ref, o_ref):
    """One (batch, hw-tile) grid step.

    x_ref : (1, maps, thw, dims) float32 block in the native input layout.
    w1_ref: (maps, dims, 64)     compute dtype (bf16/f32).
    w2_ref: (64, 128), w3_ref: (128, cout)  compute dtype.
    b*_ref: (1, c) float32.
    o_ref : (1, thw, cout) float32.
    """
    n_maps = x_ref.shape[1]
    cdt = w1_ref.dtype

    # conv1 (1x1): per-map partial matmuls accumulated in f32.  Channel order
    # is map-major / dim-minor, matching torch's permute(0,1,4,2,3) + view.
    h1 = jnp.dot(x_ref[0, 0].astype(cdt), w1_ref[0],
                 preferred_element_type=jnp.float32)
    for m in range(1, n_maps):
        h1 = h1 + jnp.dot(x_ref[0, m].astype(cdt), w1_ref[m],
                          preferred_element_type=jnp.float32)
    h1 = jnp.maximum(h1 + b1_ref[...], 0.0)

    # conv2 (1x1) + ReLU
    h2 = jnp.dot(h1.astype(cdt), w2_ref[...],
                 preferred_element_type=jnp.float32) + b2_ref[...]
    h2 = jnp.maximum(h2, 0.0)

    # conv3 (1x1) + sigmoid
    h3 = jnp.dot(h2.astype(cdt), w3_ref[...],
                 preferred_element_type=jnp.float32) + b3_ref[...]
    o_ref[0, :, :] = jax.nn.sigmoid(h3).astype(o_ref.dtype)


def _vmem_capacity_bytes():
    """Physical VMEM of the local chip; conservative fallback if unavailable."""
    try:
        return int(pltpu.get_tpu_info().vmem_capacity_bytes)
    except Exception:
        return 64 * 1024 * 1024  # v7x per-TensorCore VMEM (smallest current)


def _choose_hw_tile(HW, B, n_maps, n_dims, itemsize, budget_bytes):
    """Pick a row tile over the H*W axis of one (batch, maps, H*W, dims) slab.

    Returns (thw, HWp): tile rows and padded row count (HWp % thw == 0).
    Prefers an exact divisor of HW (no input copy); pads only when HW has no
    usable divisor (e.g. 8 * large-prime).  Never degrades to tiny tiles.
    """
    lanes = -(-n_dims // 128) * 128
    # Per-row VMEM cost: double-buffered lane-padded input block plus ~3 KB of
    # f32 intermediates (h1/h2/h3, bf16 copies, output double-buffer).
    per_row = 2 * n_maps * lanes * itemsize + 3 * 1024
    cap = max(8, budget_bytes // per_row)
    cap = min(cap, HW, 1 << 15)

    # Candidate tiles: multiples of 8 dividing HW, plus HW itself if it fits
    # (a full-extent block dim is always legal).
    cands = [t for t in range(8, cap + 1, 8) if HW % t == 0]
    if HW <= cap and HW not in cands:
        cands.append(HW)

    if not cands or (max(cands) < 128 and HW > cap):
        # Pathological HW: pad rows instead of running step-overhead-bound
        # tiny tiles (~0.35 us per grid step).
        t = max(8, (cap // 8) * 8)
        return t, -(-HW // t) * t

    best = max(cands)
    # Prefer >= 4 total (even) grid steps for v7x's two TensorCores, as long
    # as it does not shrink the tile by more than 4x.
    for t in sorted(cands, reverse=True):
        if t * 4 < best:
            break
        steps = B * (HW // t)
        if steps >= 4 and steps % 2 == 0:
            return t, HW
    return best, HW


@functools.partial(jax.jit, static_argnames=("use_bf16",))
def reconstruction_forward(x, params, *, use_bf16=True):
    """x: (B, maps, h, w, dims) float32 — same as the PyTorch module input.

    Returns: (B, reconstruct_channels, h, w) float32 — same as torch NCHW out.
    """
    w1, b1, w2, b2, w3, b3 = params
    B, n_maps, H, W, n_dims = x.shape
    cin = n_maps * n_dims
    c1, c2, cout = w1.shape[1], w2.shape[1], w3.shape[1]
    HW = H * W

    compute_dtype = jnp.bfloat16 if use_bf16 else jnp.float32
    w_bytes = jnp.dtype(compute_dtype).itemsize

    # Native-layout view: merging the contiguous (H, W) axes is a free reshape
    # (no HBM copy).  This replaces the old full transpose pass over x.
    x3 = x.reshape(B, n_maps, HW, n_dims)

    capacity = _vmem_capacity_bytes()
    budget = min(int(0.6 * capacity), 48 * 1024 * 1024)
    thw, HWp = _choose_hw_tile(HW, B, n_maps, n_dims, 4, budget)
    if HWp != HW:
        # Pathological spatial size only (no usable tile divisor): pad rows.
        x3 = jnp.pad(x3, ((0, 0), (0, 0), (0, HWp - HW), (0, 0)))

    # Per-map weight view (free reshape of the (cin, c1) matmul weight).
    w1c = w1.reshape(n_maps, n_dims, c1).astype(compute_dtype)
    w2c = w2.astype(compute_dtype)
    w3c = w3.astype(compute_dtype)
    b1f = b1.astype(jnp.float32).reshape(1, c1)
    b2f = b2.astype(jnp.float32).reshape(1, c2)
    b3f = b3.astype(jnp.float32).reshape(1, cout)

    cost = pl.CostEstimate(
        flops=2 * B * HWp * (cin * c1 + c1 * c2 + c2 * cout),
        transcendentals=B * HWp * cout,  # sigmoid
        bytes_accessed=(
            B * HWp * cin * 4                                   # native f32 input
            + B * HWp * cout * 4                                # output rows
            + (cin * c1 + c1 * c2 + c2 * cout) * w_bytes        # weights
            + (c1 + c2 + cout) * 4                              # biases
        ),
    )

    vmem_limit = int(min(max(0.75 * capacity, 32 * 1024 * 1024),
                         64 * 1024 * 1024))

    out_flat = pl.pallas_call(
        _recon_kernel,
        out_shape=jax.ShapeDtypeStruct((B, HWp, cout), jnp.float32),
        grid_spec=pltpu.PrefetchScalarGridSpec(
            num_scalar_prefetch=0,
            grid=(B, HWp // thw),
            in_specs=[
                pl.BlockSpec((1, n_maps, thw, n_dims), lambda b, i: (b, 0, i, 0)),
                pl.BlockSpec((n_maps, n_dims, c1), lambda b, i: (0, 0, 0)),
                pl.BlockSpec((1, c1), lambda b, i: (0, 0)),
                pl.BlockSpec((c1, c2), lambda b, i: (0, 0)),
                pl.BlockSpec((1, c2), lambda b, i: (0, 0)),
                pl.BlockSpec((c2, cout), lambda b, i: (0, 0)),
                pl.BlockSpec((1, cout), lambda b, i: (0, 0)),
            ],
            out_specs=pl.BlockSpec((1, thw, cout), lambda b, i: (b, i, 0)),
        ),
        compiler_params=pltpu.CompilerParams(
            dimension_semantics=("parallel", "parallel"),
            vmem_limit_bytes=vmem_limit,
        ),
        cost_estimate=cost,
    )(x3, w1c, b1f, w2c, b2f, w3c, b3f)

    # Back to NCHW: (B, HW, Cout) -> (B, H, W, Cout) -> (B, Cout, H, W).
    out = out_flat[:, :HW, :].reshape(B, H, W, cout).transpose(0, 3, 1, 2)
    return out


def init_params(key, capsin_n_maps, capsin_n_dims, reconstruct_channels):
    """Deterministic init mimicking torch.nn.Conv2d default (kaiming-uniform-ish).

    Weights are stored as (Cin, Cout) matrices (1x1 conv == matmul)."""
    cin = capsin_n_maps * capsin_n_dims
    sizes = [(cin, 64), (64, 128), (128, reconstruct_channels)]
    params = []
    for (ci, co) in sizes:
        key, kw, kb = jax.random.split(key, 3)
        bound = 1.0 / (float(ci) ** 0.5)  # fan_in for a 1x1 kernel
        w = jax.random.uniform(kw, (ci, co), jnp.float32, -bound, bound)
        b = jax.random.uniform(kb, (1, co), jnp.float32, -bound, bound)
        params += [w, b]
    return tuple(params)


def _reference_forward(x, params, *, use_bf16):
    """Pure-JAX reference mirroring the kernel dtype policy."""
    w1, b1, w2, b2, w3, b3 = params
    B, n_maps, H, W, n_dims = x.shape
    cin = n_maps * n_dims
    cout = w3.shape[1]
    dt = jnp.bfloat16 if use_bf16 else jnp.float32
    xf = jnp.transpose(x, (0, 2, 3, 1, 4)).reshape(-1, cin).astype(dt)
    h1 = jnp.maximum(
        jnp.dot(xf, w1.astype(dt), preferred_element_type=jnp.float32) + b1, 0.0)
    h2 = jnp.maximum(
        jnp.dot(h1.astype(dt), w2.astype(dt), preferred_element_type=jnp.float32) + b2, 0.0)
    out = jax.nn.sigmoid(
        jnp.dot(h2.astype(dt), w3.astype(dt), preferred_element_type=jnp.float32) + b3)
    return out.reshape(B, H, W, cout).transpose(0, 3, 1, 2)


def _reference_forward_f32(x, params):
    """Full-precision reference (exact module semantics in f32)."""
    w1, b1, w2, b2, w3, b3 = params
    B, n_maps, H, W, n_dims = x.shape
    cin = n_maps * n_dims
    cout = w3.shape[1]
    xf = jnp.transpose(x, (0, 2, 3, 1, 4)).reshape(-1, cin)
    h1 = jnp.maximum(xf @ w1 + b1, 0.0)
    h2 = jnp.maximum(h1 @ w2 + b2, 0.0)
    out = jax.nn.sigmoid(h2 @ w3 + b3)
    return out.reshape(B, H, W, cout).transpose(0, 3, 1, 2)


if __name__ == "__main__":
    # Small, deterministic example shapes consistent with the module:
    #   batch=2, capsin_n_maps=4, capsin_n_dims=8, spatial 16x16,
    #   reconstruct_channels=3.
    batch_size = 2
    capsin_n_maps = 4
    capsin_n_dims = 8
    H = W = 16
    reconstruct_channels = 3

    key = jax.random.PRNGKey(0)
    key_x, key_p = jax.random.split(key)
    x = jax.random.normal(
        key_x, (batch_size, capsin_n_maps, H, W, capsin_n_dims), jnp.float32
    )
    params = init_params(key_p, capsin_n_maps, capsin_n_dims, reconstruct_channels)

    out = reconstruction_forward(x, params, use_bf16=True)
    out = jax.block_until_ready(out)

    assert out.shape == (batch_size, reconstruct_channels, H, W), out.shape

    # Check against a reference with the same bf16 dtype policy (tight tol) ...
    ref_bf16 = _reference_forward(x, params, use_bf16=True)
    err_bf16 = float(jnp.max(jnp.abs(out - ref_bf16)))
    assert err_bf16 < 2e-3, err_bf16
    # ... and against the exact f32 module semantics (loose tol, bf16 rounding).
    ref_f32 = _reference_forward_f32(x, params)
    err_f32 = float(jnp.max(jnp.abs(out - ref_f32)))
    assert err_f32 < 5e-2, err_f32

    print("KERNEL_OK")
</pallas_src>

<mosaic_0001>
module attributes {stable_mosaic.version = 11 : i64} {
  func.func @_recon_kernel(%arg0: i32, %arg1: i32, %arg2: memref<1x4x128x8xf32, #tpu.memory_space<vmem>>, %arg3: memref<4x8x64xbf16, #tpu.memory_space<vmem>>, %arg4: memref<1x64xf32, #tpu.memory_space<vmem>>, %arg5: memref<64x128xbf16, #tpu.memory_space<vmem>>, %arg6: memref<1x128xf32, #tpu.memory_space<vmem>>, %arg7: memref<128x3xbf16, #tpu.memory_space<vmem>>, %arg8: memref<1x3xf32, #tpu.memory_space<vmem>>, %arg9: memref<1x128x3xf32, #tpu.memory_space<vmem>>) attributes {dimension_semantics = [#tpu.dimension_semantics<parallel>, #tpu.dimension_semantics<parallel>], iteration_bounds = array<i64: 2, 2>, scalar_prefetch = 0 : i64, scratch_operands = 0 : i64, tpu.core_type = #tpu.core_type<tc>, window_params = [{transform_indices = @transform_0, window_bounds = array<i64: 1, 4, 128, 8>}, {pipeline_mode = #tpu.pipeline_mode<synchronous>, transform_indices = @transform_1, window_bounds = array<i64: 4, 8, 64>}, {pipeline_mode = #tpu.pipeline_mode<synchronous>, transform_indices = @transform_2, window_bounds = array<i64: 1, 64>}, {pipeline_mode = #tpu.pipeline_mode<synchronous>, transform_indices = @transform_3, window_bounds = array<i64: 64, 128>}, {pipeline_mode = #tpu.pipeline_mode<synchronous>, transform_indices = @transform_4, window_bounds = array<i64: 1, 128>}, {pipeline_mode = #tpu.pipeline_mode<synchronous>, transform_indices = @transform_5, window_bounds = array<i64: 128, 3>}, {pipeline_mode = #tpu.pipeline_mode<synchronous>, transform_indices = @transform_6, window_bounds = array<i64: 1, 3>}, {transform_indices = @transform_7, window_bounds = array<i64: 1, 128, 3>}]} {
    %c0 = arith.constant 0 : index
    %c0_0 = arith.constant 0 : index
    %c0_1 = arith.constant 0 : index
    %c0_2 = arith.constant 0 : index
    %0 = vector.load %arg2[%c0, %c0_0, %c0_1, %c0_2] : memref<1x4x128x8xf32, #tpu.memory_space<vmem>>, vector<1x1x128x8xf32>
    %1 = vector.shape_cast %0 : vector<1x1x128x8xf32> to vector<128x8xf32>
    %2 = arith.truncf %1 : vector<128x8xf32> to vector<128x8xbf16>
    %c0_3 = arith.constant 0 : index
    %c0_4 = arith.constant 0 : index
    %c0_5 = arith.constant 0 : index
    %3 = vector.load %arg3[%c0_3, %c0_4, %c0_5] : memref<4x8x64xbf16, #tpu.memory_space<vmem>>, vector<1x8x64xbf16>
    %4 = vector.shape_cast %3 : vector<1x8x64xbf16> to vector<8x64xbf16>
    %cst = arith.constant dense<0.000000e+00> : vector<128x64xf32>
    %5 = tpu.matmul %2, %4, %cst {dimension_numbers = #tpu.dot_dimension_numbers<[1], [0], [0], [1], [0, 0, 1, 1], [], []>} : vector<128x8xbf16>, vector<8x64xbf16>, vector<128x64xf32> -> vector<128x64xf32>
    %c0_6 = arith.constant 0 : index
    %c1 = arith.constant 1 : index
    %c0_7 = arith.constant 0 : index
    %c0_8 = arith.constant 0 : index
    %6 = vector.load %arg2[%c0_6, %c1, %c0_7, %c0_8] : memref<1x4x128x8xf32, #tpu.memory_space<vmem>>, vector<1x1x128x8xf32>
    %7 = vector.shape_cast %6 : vector<1x1x128x8xf32> to vector<128x8xf32>
    %8 = arith.truncf %7 : vector<128x8xf32> to vector<128x8xbf16>
    %c1_9 = arith.constant 1 : index
    %c0_10 = arith.constant 0 : index
    %c0_11 = arith.constant 0 : index
    %9 = vector.load %arg3[%c1_9, %c0_10, %c0_11] : memref<4x8x64xbf16, #tpu.memory_space<vmem>>, vector<1x8x64xbf16>
    %10 = vector.shape_cast %9 : vector<1x8x64xbf16> to vector<8x64xbf16>
    %cst_12 = arith.constant dense<0.000000e+00> : vector<128x64xf32>
    %11 = tpu.matmul %8, %10, %cst_12 {dimension_numbers = #tpu.dot_dimension_numbers<[1], [0], [0], [1], [0, 0, 1, 1], [], []>} : vector<128x8xbf16>, vector<8x64xbf16>, vector<128x64xf32> -> vector<128x64xf32>
    %12 = arith.addf %5, %11 : vector<128x64xf32>
    %c0_13 = arith.constant 0 : index
    %c2 = arith.constant 2 : index
    %c0_14 = arith.constant 0 : index
    %c0_15 = arith.constant 0 : index
    %13 = vector.load %arg2[%c0_13, %c2, %c0_14, %c0_15] : memref<1x4x128x8xf32, #tpu.memory_space<vmem>>, vector<1x1x128x8xf32>
    %14 = vector.shape_cast %13 : vector<1x1x128x8xf32> to vector<128x8xf32>
    %15 = arith.truncf %14 : vector<128x8xf32> to vector<128x8xbf16>
    %c2_16 = arith.constant 2 : index
    %c0_17 = arith.constant 0 : index
    %c0_18 = arith.constant 0 : index
    %16 = vector.load %arg3[%c2_16, %c0_17, %c0_18] : memref<4x8x64xbf16, #tpu.memory_space<vmem>>, vector<1x8x64xbf16>
    %17 = vector.shape_cast %16 : vector<1x8x64xbf16> to vector<8x64xbf16>
    %cst_19 = arith.constant dense<0.000000e+00> : vector<128x64xf32>
    %18 = tpu.matmul %15, %17, %cst_19 {dimension_numbers = #tpu.dot_dimension_numbers<[1], [0], [0], [1], [0, 0, 1, 1], [], []>} : vector<128x8xbf16>, vector<8x64xbf16>, vector<128x64xf32> -> vector<128x64xf32>
    %19 = arith.addf %12, %18 : vector<128x64xf32>
    %c0_20 = arith.constant 0 : index
    %c3 = arith.constant 3 : index
    %c0_21 = arith.constant 0 : index
    %c0_22 = arith.constant 0 : index
    %20 = vector.load %arg2[%c0_20, %c3, %c0_21, %c0_22] : memref<1x4x128x8xf32, #tpu.memory_space<vmem>>, vector<1x1x128x8xf32>
    %21 = vector.shape_cast %20 : vector<1x1x128x8xf32> to vector<128x8xf32>
    %22 = arith.truncf %21 : vector<128x8xf32> to vector<128x8xbf16>
    %c3_23 = arith.constant 3 : index
    %c0_24 = arith.constant 0 : index
    %c0_25 = arith.constant 0 : index
    %23 = vector.load %arg3[%c3_23, %c0_24, %c0_25] : memref<4x8x64xbf16, #tpu.memory_space<vmem>>, vector<1x8x64xbf16>
    %24 = vector.shape_cast %23 : vector<1x8x64xbf16> to vector<8x64xbf16>
    %cst_26 = arith.constant dense<0.000000e+00> : vector<128x64xf32>
    %25 = tpu.matmul %22, %24, %cst_26 {dimension_numbers = #tpu.dot_dimension_numbers<[1], [0], [0], [1], [0, 0, 1, 1], [], []>} : vector<128x8xbf16>, vector<8x64xbf16>, vector<128x64xf32> -> vector<128x64xf32>
    %26 = arith.addf %19, %25 : vector<128x64xf32>
    %c0_27 = arith.constant 0 : index
    %c0_28 = arith.constant 0 : index
    %27 = vector.load %arg4[%c0_27, %c0_28] : memref<1x64xf32, #tpu.memory_space<vmem>>, vector<1x64xf32>
    %28 = vector.broadcast %27 : vector<1x64xf32> to vector<128x64xf32>
    %29 = arith.addf %26, %28 : vector<128x64xf32>
    %cst_29 = arith.constant 0.000000e+00 : f32
    %30 = vector.broadcast %cst_29 : f32 to vector<128x64xf32>
    %31 = arith.maximumf %29, %30 : vector<128x64xf32>
    %32 = arith.truncf %31 : vector<128x64xf32> to vector<128x64xbf16>
    %c0_30 = arith.constant 0 : index
    %c0_31 = arith.constant 0 : index
    %33 = vector.load %arg5[%c0_30, %c0_31] : memref<64x128xbf16, #tpu.memory_space<vmem>>, vector<64x128xbf16>
    %cst_32 = arith.constant dense<0.000000e+00> : vector<128x128xf32>
    %34 = tpu.matmul %32, %33, %cst_32 {dimension_numbers = #tpu.dot_dimension_numbers<[1], [0], [0], [1], [0, 0, 1, 1], [], []>} : vector<128x64xbf16>, vector<64x128xbf16>, vector<128x128xf32> -> vector<128x128xf32>
    %c0_33 = arith.constant 0 : index
    %c0_34 = arith.constant 0 : index
    %35 = vector.load %arg6[%c0_33, %c0_34] : memref<1x128xf32, #tpu.memory_space<vmem>>, vector<1x128xf32>
    %36 = vector.broadcast %35 : vector<1x128xf32> to vector<128x128xf32>
    %37 = arith.addf %34, %36 : vector<128x128xf32>
    %cst_35 = arith.constant 0.000000e+00 : f32
    %38 = vector.broadcast %cst_35 : f32 to vector<128x128xf32>
    %39 = arith.maximumf %37, %38 : vector<128x128xf32>
    %40 = arith.truncf %39 : vector<128x128xf32> to vector<128x128xbf16>
    %c0_36 = arith.constant 0 : index
    %c0_37 = arith.constant 0 : index
    %41 = vector.load %arg7[%c0_36, %c0_37] : memref<128x3xbf16, #tpu.memory_space<vmem>>, vector<128x3xbf16>
    %cst_38 = arith.constant dense<0.000000e+00> : vector<128x3xf32>
    %42 = tpu.matmul %40, %41, %cst_38 {dimension_numbers = #tpu.dot_dimension_numbers<[1], [0], [0], [1], [0, 0, 1, 1], [], []>} : vector<128x128xbf16>, vector<128x3xbf16>, vector<128x3xf32> -> vector<128x3xf32>
    %c0_39 = arith.constant 0 : index
    %c0_40 = arith.constant 0 : index
    %43 = vector.load %arg8[%c0_39, %c0_40] : memref<1x3xf32, #tpu.memory_space<vmem>>, vector<1x3xf32>
    %44 = vector.broadcast %43 : vector<1x3xf32> to vector<128x3xf32>
    %45 = arith.addf %42, %44 : vector<128x3xf32>
    %46 = arith.negf %45 : vector<128x3xf32>
    %47 = math.exp %46 : vector<128x3xf32>
    %cst_41 = arith.constant 1.000000e+00 : f32
    %48 = vector.broadcast %cst_41 : f32 to vector<128x3xf32>
    %49 = arith.addf %48, %47 : vector<128x3xf32>
    %50 = arith.divf %48, %49 : vector<128x3xf32>
    %c0_42 = arith.constant 0 : index
    %c0_43 = arith.constant 0 : index
    %c0_44 = arith.constant 0 : index
    %51 = vector.load %arg9[%c0_42, %c0_43, %c0_44] : memref<1x128x3xf32, #tpu.memory_space<vmem>>, vector<1x128x3xf32>
    %52 = vector.shape_cast %51 : vector<1x128x3xf32> to vector<128x3xf32>
    %53 = vector.shape_cast %50 : vector<128x3xf32> to vector<1x128x3xf32>
    tpu.vector_store %arg9[%c0_42, %c0_43, %c0_44], %53 {strides = array<i32>} : memref<1x128x3xf32, #tpu.memory_space<vmem>>, vector<1x128x3xf32>,
    return
  }
  func.func @transform_0(%arg0: i32, %arg1: i32) -> (i32, i32, i32, i32) {
    %c0_i32 = arith.constant 0 : i32
    %c0_i32_0 = arith.constant 0 : i32
    %c0_i32_1 = arith.constant 0 : i32
    return %arg0, %c0_i32, %arg1, %c0_i32_0 : i32, i32, i32, i32
  }
  func.func @transform_1(%arg0: i32, %arg1: i32) -> (i32, i32, i32) {
    %c0_i32 = arith.constant 0 : i32
    %c0_i32_0 = arith.constant 0 : i32
    %c0_i32_1 = arith.constant 0 : i32
    %c0_i32_2 = arith.constant 0 : i32
    return %c0_i32, %c0_i32_0, %c0_i32_1 : i32, i32, i32
  }
  func.func @transform_2(%arg0: i32, %arg1: i32) -> (i32, i32) {
    %c0_i32 = arith.constant 0 : i32
    %c0_i32_0 = arith.constant 0 : i32
    %c0_i32_1 = arith.constant 0 : i32
    return %c0_i32, %c0_i32_0 : i32, i32
  }
  func.func @transform_3(%arg0: i32, %arg1: i32) -> (i32, i32) {
    %c0_i32 = arith.constant 0 : i32
    %c0_i32_0 = arith.constant 0 : i32
    %c0_i32_1 = arith.constant 0 : i32
    return %c0_i32, %c0_i32_0 : i32, i32
  }
  func.func @transform_4(%arg0: i32, %arg1: i32) -> (i32, i32) {
    %c0_i32 = arith.constant 0 : i32
    %c0_i32_0 = arith.constant 0 : i32
    %c0_i32_1 = arith.constant 0 : i32
    return %c0_i32, %c0_i32_0 : i32, i32
  }
  func.func @transform_5(%arg0: i32, %arg1: i32) -> (i32, i32) {
    %c0_i32 = arith.constant 0 : i32
    %c0_i32_0 = arith.constant 0 : i32
    %c0_i32_1 = arith.constant 0 : i32
    return %c0_i32, %c0_i32_0 : i32, i32
  }
  func.func @transform_6(%arg0: i32, %arg1: i32) -> (i32, i32) {
    %c0_i32 = arith.constant 0 : i32
    %c0_i32_0 = arith.constant 0 : i32
    %c0_i32_1 = arith.constant 0 : i32
    return %c0_i32, %c0_i32_0 : i32, i32
  }
  func.func @transform_7(%arg0: i32, %arg1: i32) -> (i32, i32, i32) {
    %c0_i32 = arith.constant 0 : i32
    %c0_i32_0 = arith.constant 0 : i32
    return %arg0, %arg1, %c0_i32 : i32, i32, i32
  }
}

</mosaic_0001>

<bundles_post_ra>
// kernel: reconstruction_forward.1
= control target key start
LH: loop header
LB: loop body
LE: loop exit
PB: predicated region body
PF: predicated region fallthrough
CT: control target
= control target key end

     0   :  { %s2446_s24 = smov 0   ;;  %s2448_s25 = smov 0   ;;  %s2925_s0 = inlined_call_operand.vmem [shape: f32[2,4,256,8], index: 0, kind: input, shape index: {}]   ;;  %s2926_s1 = inlined_call_operand.vmem [shape: bf16[4,8,64], index: 1, kind: input, shape index: {}]   ;;  %s2927_s2 = inlined_call_operand.vmem [shape: f32[1,64], index: 2, kind: input, shape index: {}]   ;;  %s2928_s3 = inlined_call_operand.vmem [shape: bf16[64,128], index: 3, kind: input, shape index: {}]   ;;  %s2929_s4 = inlined_call_operand.vmem [shape: f32[1,128], index: 4, kind: input, shape index: {}]   ;;  %s2930_s5 = inlined_call_operand.vmem [shape: bf16[128,3], index: 5, kind: input, shape index: {}]   ;;  %s2931_s6 = inlined_call_operand.vmem [shape: f32[1,3], index: 6, kind: input, shape index: {}]   ;;  %s2932_s7 = inlined_call_operand.vmem [shape: f32[2,256,3], index: 7, kind: output, shape index: {}]  }
   0x1   :  { %s2450_s26 = smov 0   ;;  %s2452_s27 = smov 0  }
   0x2   :  { %s2454_s28 = smov 0   ;;  %s2456_s29 = smov 0  }
   0x3   :  { %s2458_s30 = smov 0  }
   0x4 LB: > { %s26_s8 = sadd.s32 1, %s2396_s28  ;;  %s29_s9 = sadd.s32 1, %s2400_s29  ;;  %s2404_s30 = sphi %s2458_s30, %s17_s30   ;;  %s2400_s29 = sphi %s2456_s29, %s2938_s29   ;;  %s2396_s28 = sphi %s2454_s28, %s2937_s28   ;;  %s2392_s27 = sphi %s2452_s27, %s2936_s27   ;;  %s2388_s26 = sphi %s2450_s26, %s2935_s26   ;;  %s2384_s25 = sphi %s2448_s25, %s2934_s25   ;;  %s2380_s24 = sphi %s2446_s24, %s2933_s24  }
   0x5   : > { %p27_p0 = scmp.ge.s32.totalorder %s26_s8, 2  ;;  %p45_p1 = scmp.ne.s32.totalorder %s2384_s25, %s2380_s24 }
   0x6   : > { %p46_p2 = scmp.eq.s32.totalorder %s2404_s30, 0  ;;  %s38_s13 = sadd.s32 1, %s2384_s25 }
   0x7   : > { %s2940_s8 = smov (%p27_p0, %s26_s8), 0  ;;  %s2942_s9 = smov (!%p27_p0, %s29_s9), %s2400_s29 }
   0x8   : > { %p47_p3 = por %p46_p2, %p45_p1  ;;  %p31_p4 = scmp.ge.s32.totalorder %s2942_s9, 2 }
   0x9   : > { %s34_s10 = ssub.s32 %s2396_s28, %s2940_s8  ;;  %p1840_p6 = scmp.ge.s32.totalorder %s2404_s30, 4 }
   0xa   : > { %s2944_s9 = smov (%p31_p4, %s2942_s9), 0 }
   0xb   : > { %s33_s11 = ssub.s32 %s2400_s29, %s2944_s9  ;;  %243 = sbr.rel (%p1840_p6) target bundleno = 57 (0x39), region = 40 }
   0xc   : > { %s35_s12 = sor.u32 %s34_s10, %s33_s11 }
   0xd   : > { %p36_p5 = scmp.eq.s32.totalorder %s35_s12, 0 }
   0xf   : > { %s2497_s14 = scalar_select %p36_p5, %s2384_s25, %s38_s13  }
  0x12   : > { %246 = sbr.rel (!%p47_p3) target bundleno = 57 (0x39), region = 44  ;;  %s248_s15 = sand.u32 (%p47_p3), 1, %s2384_s25  }
  0x13   : > { %s1842_s16 = sshll.u32 (%p47_p3), %s2396_s28, 4  ;;  %s1841_s17 = sshll.u32 (%p47_p3), %s248_s15, 9 }
  0x14   : > { %s1843_s18 = sshll.u32 (%p47_p3), %s2400_s29, 7  ;;  %s2511_s10 = scalar_lea.vmem (%p47_p3), [#allocation2], %s1841_s17 }
  0x15   : > { %s253_s19 = sadd.s32 (%p47_p3), %s1843_s18, %s1842_s16 }
  0x16   : > { %s1844_s20 = sshll.u32 (%p47_p3), %s253_s19, 3 }
  0x17   : > { %s2506_s23 = scalar_lea.vmem (%p47_p3), %s2925_s0, %s1844_s20 }
  0x18   : > { %v409_v0 = vld [vmem:[%s2506_s23] sm:$0xff] (%p47_p3)  ;;  %v411_v1 = vld [vmem:[%s2506_s23 + $0x8] sm:$0xff] (%p47_p3)  ;;  %v413_v2 = vld [vmem:[%s2506_s23 + $0x10] sm:$0xff] (%p47_p3) }
  0x19   : > { %410 = vst [vmem:[%s2511_s10] sm:$0xff] %v409_v0  ;;  %412 = vst [vmem:[%s2511_s10 + $0x8] sm:$0xff] %v411_v1  ;;  %v415_v3 = vld [vmem:[%s2506_s23 + $0x18] sm:$0xff]  ;;  %v417_v4 = vld [vmem:[%s2506_s23 + $0x20] sm:$0xff] }
  0x1a   : > { %414 = vst [vmem:[%s2511_s10 + $0x10] sm:$0xff] %v413_v2  ;;  %v419_v5 = vld [vmem:[%s2506_s23 + $0x28] sm:$0xff]  ;;  %416 = vst [vmem:[%s2511_s10 + $0x18] sm:$0xff] %v415_v3  ;;  %v421_v6 = vld [vmem:[%s2506_s23 + $0x30] sm:$0xff] }
  0x1b   : > { %418 = vst [vmem:[%s2511_s10 + $0x20] sm:$0xff] %v417_v4  ;;  %420 = vst [vmem:[%s2511_s10 + $0x28] sm:$0xff] %v419_v5  ;;  %v423_v7 = vld [vmem:[%s2506_s23 + $0x38] sm:$0xff]  ;;  %v425_v8 = vld [vmem:[%s2506_s23 + $0x40] sm:$0xff] }
  0x1c   : > { %422 = vst [vmem:[%s2511_s10 + $0x30] sm:$0xff] %v421_v6  ;;  %424 = vst [vmem:[%s2511_s10 + $0x38] sm:$0xff] %v423_v7  ;;  %v427_v9 = vld [vmem:[%s2506_s23 + $0x48] sm:$0xff]  ;;  %v429_v10 = vld [vmem:[%s2506_s23 + $0x50] sm:$0xff] }
  0x1d   : > { %426 = vst [vmem:[%s2511_s10 + $0x40] sm:$0xff] %v425_v8  ;;  %v431_v11 = vld [vmem:[%s2506_s23 + $0x58] sm:$0xff]  ;;  %428 = vst [vmem:[%s2511_s10 + $0x48] sm:$0xff] %v427_v9  ;;  %v433_v12 = vld [vmem:[%s2506_s23 + $0x60] sm:$0xff] }
  0x1e   : > { %430 = vst [vmem:[%s2511_s10 + $0x50] sm:$0xff] %v429_v10  ;;  %432 = vst [vmem:[%s2511_s10 + $0x58] sm:$0xff] %v431_v11  ;;  %v435_v13 = vld [vmem:[%s2506_s23 + $0x68] sm:$0xff]  ;;  %v437_v14 = vld [vmem:[%s2506_s23 + $0x70] sm:$0xff] }
  0x1f   : > { %434 = vst [vmem:[%s2511_s10 + $0x60] sm:$0xff] %v433_v12  ;;  %436 = vst [vmem:[%s2511_s10 + $0x68] sm:$0xff] %v435_v13  ;;  %v439_v15 = vld [vmem:[%s2506_s23 + $0x78] sm:$0xff]  ;;  %v441_v16 = vld [vmem:[%s2506_s23 + $0x100] sm:$0xff] }
  0x20   : > { %438 = vst [vmem:[%s2511_s10 + $0x70] sm:$0xff] %v437_v14  ;;  %v443_v17 = vld [vmem:[%s2506_s23 + $0x108] sm:$0xff]  ;;  %440 = vst [vmem:[%s2511_s10 + $0x78] sm:$0xff] %v439_v15  ;;  %v445_v18 = vld [vmem:[%s2506_s23 + $0x110] sm:$0xff] }
  0x21   : > { %442 = vst [vmem:[%s2511_s10 + $0x80] sm:$0xff] %v441_v16  ;;  %444 = vst [vmem:[%s2511_s10 + $0x88] sm:$0xff] %v443_v17  ;;  %v447_v19 = vld [vmem:[%s2506_s23 + $0x118] sm:$0xff]  ;;  %v449_v20 = vld [vmem:[%s2506_s23 + $0x120] sm:$0xff] }
  0x22   : > { %446 = vst [vmem:[%s2511_s10 + $0x90] sm:$0xff] %v445_v18  ;;  %448 = vst [vmem:[%s2511_s10 + $0x98] sm:$0xff] %v447_v19  ;;  %v451_v21 = vld [vmem:[%s2506_s23 + $0x128] sm:$0xff]  ;;  %v453_v22 = vld [vmem:[%s2506_s23 + $0x130] sm:$0xff] }
  0x23   : > { %450 = vst [vmem:[%s2511_s10 + $0xa0] sm:$0xff] %v449_v20  ;;  %v455_v23 = vld [vmem:[%s2506_s23 + $0x138] sm:$0xff]  ;;  %452 = vst [vmem:[%s2511_s10 + $0xa8] sm:$0xff] %v451_v21  ;;  %v457_v24 = vld [vmem:[%s2506_s23 + $0x140] sm:$0xff] }
  0x24   : > { %454 = vst [vmem:[%s2511_s10 + $0xb0] sm:$0xff] %v453_v22  ;;  %456 = vst [vmem:[%s2511_s10 + $0xb8] sm:$0xff] %v455_v23  ;;  %v459_v25 = vld [vmem:[%s2506_s23 + $0x148] sm:$0xff]  ;;  %v461_v26 = vld [vmem:[%s2506_s23 + $0x150] sm:$0xff] }
  0x25   : > { %458 = vst [vmem:[%s2511_s10 + $0xc0] sm:$0xff] %v457_v24  ;;  %460 = vst [vmem:[%s2511_s10 + $0xc8] sm:$0xff] %v459_v25  ;;  %v463_v27 = vld [vmem:[%s2506_s23 + $0x158] sm:$0xff]  ;;  %v465_v28 = vld [vmem:[%s2506_s23 + $0x160] sm:$0xff] }
  0x26   : > { %462 = vst [vmem:[%s2511_s10 + $0xd0] sm:$0xff] %v461_v26  ;;  %v467_v29 = vld [vmem:[%s2506_s23 + $0x168] sm:$0xff]  ;;  %464 = vst [vmem:[%s2511_s10 + $0xd8] sm:$0xff] %v463_v27  ;;  %v469_v30 = vld [vmem:[%s2506_s23 + $0x170] sm:$0xff] }
  0x27   : > { %466 = vst [vmem:[%s2511_s10 + $0xe0] sm:$0xff] %v465_v28  ;;  %468 = vst [vmem:[%s2511_s10 + $0xe8] sm:$0xff] %v467_v29  ;;  %v471_v31 = vld [vmem:[%s2506_s23 + $0x178] sm:$0xff]  ;;  %v473_v32 = vld [vmem:[%s2506_s23 + $0x200] sm:$0xff] }
  0x28   : > { %470 = vst [vmem:[%s2511_s10 + $0xf0] sm:$0xff] %v469_v30  ;;  %472 = vst [vmem:[%s2511_s10 + $0xf8] sm:$0xff] %v471_v31  ;;  %v475_v33 = vld [vmem:[%s2506_s23 + $0x208] sm:$0xff]  ;;  %v477_v34 = vld [vmem:[%s2506_s23 + $0x210] sm:$0xff] }
  0x29   : > { %474 = vst [vmem:[%s2511_s10 + $0x100] sm:$0xff] %v473_v32  ;;  %v479_v35 = vld [vmem:[%s2506_s23 + $0x218] sm:$0xff]  ;;  %476 = vst [vmem:[%s2511_s10 + $0x108] sm:$0xff] %v475_v33  ;;  %v481_v36 = vld [vmem:[%s2506_s23 + $0x220] sm:$0xff] }
  0x2a   : > { %478 = vst [vmem:[%s2511_s10 + $0x110] sm:$0xff] %v477_v34  ;;  %480 = vst [vmem:[%s2511_s10 + $0x118] sm:$0xff] %v479_v35  ;;  %v483_v37 = vld [vmem:[%s2506_s23 + $0x228] sm:$0xff]  ;;  %v485_v38 = vld [vmem:[%s2506_s23 + $0x230] sm:$0xff] }
  0x2b   : > { %482 = vst [vmem:[%s2511_s10 + $0x120] sm:$0xff] %v481_v36  ;;  %484 = vst [vmem:[%s2511_s10 + $0x128] sm:$0xff] %v483_v37  ;;  %v487_v39 = vld [vmem:[%s2506_s23 + $0x238] sm:$0xff]  ;;  %v489_v40 = vld [vmem:[%s2506_s23 + $0x240] sm:$0xff] }
  0x2c   : > { %486 = vst [vmem:[%s2511_s10 + $0x130] sm:$0xff] %v485_v38  ;;  %v491_v41 = vld [vmem:[%s2506_s23 + $0x248] sm:$0xff]  ;;  %488 = vst [vmem:[%s2511_s10 + $0x138] sm:$0xff] %v487_v39  ;;  %v493_v42 = vld [vmem:[%s2506_s23 + $0x250] sm:$0xff] }
  0x2d   : > { %490 = vst [vmem:[%s2511_s10 + $0x140] sm:$0xff] %v489_v40  ;;  %492 = vst [vmem:[%s2511_s10 + $0x148] sm:$0xff] %v491_v41  ;;  %v495_v43 = vld [vmem:[%s2506_s23 + $0x258] sm:$0xff]  ;;  %v497_v44 = vld [vmem:[%s2506_s23 + $0x260] sm:$0xff] }
  0x2e   : > { %494 = vst [vmem:[%s2511_s10 + $0x150] sm:$0xff] %v493_v42  ;;  %496 = vst [vmem:[%s2511_s10 + $0x158] sm:$0xff] %v495_v43  ;;  %v499_v45 = vld [vmem:[%s2506_s23 + $0x268] sm:$0xff]  ;;  %v501_v46 = vld [vmem:[%s2506_s23 + $0x270] sm:$0xff] }
  0x2f   : > { %498 = vst [vmem:[%s2511_s10 + $0x160] sm:$0xff] %v497_v44  ;;  %v503_v47 = vld [vmem:[%s2506_s23 + $0x278] sm:$0xff]  ;;  %500 = vst [vmem:[%s2511_s10 + $0x168] sm:$0xff] %v499_v45  ;;  %v505_v48 = vld [vmem:[%s2506_s23 + $0x300] sm:$0xff] }
  0x30   : > { %502 = vst [vmem:[%s2511_s10 + $0x170] sm:$0xff] %v501_v46  ;;  %504 = vst [vmem:[%s2511_s10 + $0x178] sm:$0xff] %v503_v47  ;;  %v507_v49 = vld [vmem:[%s2506_s23 + $0x308] sm:$0xff]  ;;  %v509_v50 = vld [vmem:[%s2506_s23 + $0x310] sm:$0xff] }
  0x31   : > { %506 = vst [vmem:[%s2511_s10 + $0x180] sm:$0xff] %v505_v48  ;;  %508 = vst [vmem:[%s2511_s10 + $0x188] sm:$0xff] %v507_v49  ;;  %v511_v51 = vld [vmem:[%s2506_s23 + $0x318] sm:$0xff]  ;;  %v513_v52 = vld [vmem:[%s2506_s23 + $0x320] sm:$0xff] }
  0x32   : > { %510 = vst [vmem:[%s2511_s10 + $0x190] sm:$0xff] %v509_v50  ;;  %v515_v53 = vld [vmem:[%s2506_s23 + $0x328] sm:$0xff]  ;;  %512 = vst [vmem:[%s2511_s10 + $0x198] sm:$0xff] %v511_v51  ;;  %v517_v54 = vld [vmem:[%s2506_s23 + $0x330] sm:$0xff] }
  0x33   : > { %514 = vst [vmem:[%s2511_s10 + $0x1a0] sm:$0xff] %v513_v52  ;;  %516 = vst [vmem:[%s2511_s10 + $0x1a8] sm:$0xff] %v515_v53  ;;  %v519_v55 = vld [vmem:[%s2506_s23 + $0x338] sm:$0xff]  ;;  %v521_v56 = vld [vmem:[%s2506_s23 + $0x340] sm:$0xff] }
  0x34   : > { %518 = vst [vmem:[%s2511_s10 + $0x1b0] sm:$0xff] %v517_v54  ;;  %520 = vst [vmem:[%s2511_s10 + $0x1b8] sm:$0xff] %v519_v55  ;;  %v523_v57 = vld [vmem:[%s2506_s23 + $0x348] sm:$0xff]  ;;  %v525_v58 = vld [vmem:[%s2506_s23 + $0x350] sm:$0xff] }
  0x35   : > { %522 = vst [vmem:[%s2511_s10 + $0x1c0] sm:$0xff] %v521_v56  ;;  %v527_v59 = vld [vmem:[%s2506_s23 + $0x358] sm:$0xff]  ;;  %524 = vst [vmem:[%s2511_s10 + $0x1c8] sm:$0xff] %v523_v57  ;;  %v529_v60 = vld [vmem:[%s2506_s23 + $0x360] sm:$0xff] }
  0x36   : > { %526 = vst [vmem:[%s2511_s10 + $0x1d0] sm:$0xff] %v525_v58  ;;  %528 = vst [vmem:[%s2511_s10 + $0x1d8] sm:$0xff] %v527_v59  ;;  %v531_v61 = vld [vmem:[%s2506_s23 + $0x368] sm:$0xff]  ;;  %v533_v62 = vld [vmem:[%s2506_s23 + $0x370] sm:$0xff] }
  0x37   : > { %530 = vst [vmem:[%s2511_s10 + $0x1e0] sm:$0xff] %v529_v60  ;;  %532 = vst [vmem:[%s2511_s10 + $0x1e8] sm:$0xff] %v531_v61  ;;  %v535_v63 = vld [vmem:[%s2506_s23 + $0x378] sm:$0xff] }
  0x38   : > { %534 = vst [vmem:[%s2511_s10 + $0x1f0] sm:$0xff] %v533_v62  ;;  %536 = vst [vmem:[%s2511_s10 + $0x1f8] sm:$0xff] %v535_v63 }
  0x39 PF: > { %p1845_p7 = scmp.ge.s32.totalorder %s2404_s30, 1  ;;  %p541_p8 = scmp.lt.s32.totalorder %s2404_s30, 5 }
  0x3b   : > { %p542_p9 = pnand %p1845_p7, %p541_p8 }
  0x3c   : > { %v619_v0 = vld [vmem:[%s2926_s1] sm:$0xf] (!%p542_p9)  ;;  %vm672_vm0 = vcmask (!%p542_p9), 1043456   ;;  %s548_s13 = sand.u32 (!%p542_p9), 1, %s2380_s24   ;;  %v1899_v2 = vld [vmem:[%s2926_s1 + $0x8] sm:$0xf] (!%p542_p9) }
  0x3d   : > { %545 = sbr.rel (%p542_p9) target bundleno = 846 (0x34e), region = 82  ;;  %2215 = vmatprep.subr.msk.bf16.mxu0 (!%p542_p9), %vm672_vm0, %v619_v0  ;;  %v798_v1 = vsel (!%p542_p9), %vm672_vm0, %v619_v0, 0  ;;  %s1846_s15 = sshll.u32 (!%p542_p9), %s548_s13, 9  ;;  %v2274_v3 = vld [vmem:[%s2928_s3] sm:$0xff] (!%p542_p9)   ;;  %vm647_vm1 = vcmask (!%p542_p9), 64512   ;;  %v949_v14 = vsel (!%p542_p9), %vm672_vm0, %v1899_v2, 0 }
  0x3e   : > { %2057 = vmatpush3.bf16.msra.mxu0 (!%p542_p9), %v798_v1  ;;  %v1866_v4 = vld [vmem:[%s2926_s1 + $0x4] sm:$0xf] (!%p542_p9)  ;;  %s2655_s22 = scalar_lea.vmem (!%p542_p9), [#allocation2], %s1846_s15  ;;  %v2671_v16 = vld [vmem:[%s2926_s1 + $0xc] sm:$0xf] (!%p542_p9)  ;;  %v2276_v53 = vld [vmem:[%s2928_s3 + $0x10] sm:$0xff] (!%p542_p9)  }
  0x3f   : > { %v595_v5 = vld [vmem:[%s2655_s22] sm:$0xff] (!%p542_p9)  ;;  %v596_v6 = vld [vmem:[%s2655_s22 + $0x8] sm:$0xff] (!%p542_p9)  ;;  %2216 = vmatprep.subr.msk.bf16.mxu0 (!%p542_p9), %vm672_vm0, %v1899_v2  ;;  %v597_v7 = vld [vmem:[%s2655_s22 + $0x10] sm:$0xff] (!%p542_p9)  ;;  %2214 = vmatprep.subr.msk.bf16.mxu1 (!%p542_p9), %vm672_vm0, %v1866_v4  ;;  %v674_v8 = vsel (!%p542_p9), %vm672_vm0, %v1866_v4, 0  ;;  %v1116_v2 = vsel (!%p542_p9), %vm672_vm0, %v2671_v16, 0  ;;  %vm1317_vm2 = vcmask (!%p542_p9), 523264  }
  0x40   : > { %v611_v9 = vpack.c.bf16 (!%p542_p9), %v596_v6, %v595_v5  ;;  %v598_v10 = vld [vmem:[%s2655_s22 + $0x18] sm:$0xff] (!%p542_p9)  ;;  %v599_v11 = vld [vmem:[%s2655_s22 + $0x20] sm:$0xff] (!%p542_p9)  ;;  %v600_v12 = vld [vmem:[%s2655_s22 + $0x28] sm:$0xff] (!%p542_p9)  ;;  %2039 = vmatpush3.bf16.msra.mxu1 (!%p542_p9), %v674_v8  ;;  %s1847_s10 = sshll.u32 (!%p542_p9), %s2388_s26, 4  ;;  %p585_p10 = scmp.lt.s32.totalorder (!%p542_p9), %s2392_s27, 1  ;;  %vm1727_vm3 = vcmask (!%p542_p9), 23552  }
  0x41   : > { %v612_v13 = vpack.c.bf16 (!%p542_p9), %v598_v10, %v597_v7  ;;  %v613_v15 = vpack.c.bf16 (!%p542_p9), %v600_v12, %v599_v11  ;;  %2110 = vmatprep.subr.bf16.mxu1 (!%p542_p9), %v2274_v3  ;;  %v601_v17 = vld [vmem:[%s2655_s22 + $0x30] sm:$0xff] (!%p542_p9)  ;;  %v602_v18 = vld [vmem:[%s2655_s22 + $0x38] sm:$0xff] (!%p542_p9)  ;;  %v603_v19 = vld [vmem:[%s2655_s22 + $0x40] sm:$0xff] (!%p542_p9)  ;;  %p587_p11 = scmp.lt.s32.totalorder (!%p542_p9), %s1847_s10, 31 }
  0x42   : > { %2058 = vmatprep.mubr.msk.bf16.mxu0 (!%p542_p9), %vm647_vm1, %v611_v9  ;;  %v604_v20 = vld [vmem:[%s2655_s22 + $0x48] sm:$0xff] (!%p542_p9)  ;;  %v614_v21 = vpack.c.bf16 (!%p542_p9), %v602_v18, %v601_v17  ;;  %v1850_v23 = vld [vmem:[%s2655_s22 + $0x80] sm:$0xff] (!%p542_p9)  ;;  %v1852_v25 = vld [vmem:[%s2655_s22 + $0x90] sm:$0xff] (!%p542_p9) }
  0x43   : > { %2059 = vmatmul.mubr.msk.bf16.vlgmr.msra.gmra.mrb[0].mxu0 (!%p542_p9), %vm647_vm1, %v612_v13  ;;  %v615_v22 = vpack.c.bf16 (!%p542_p9), %v604_v20, %v603_v19  ;;  %v1851_v24 = vld [vmem:[%s2655_s22 + $0x88] sm:$0xff] (!%p542_p9)  ;;  %v1853_v26 = vld [vmem:[%s2655_s22 + $0x98] sm:$0xff] (!%p542_p9)  ;;  %v605_v27 = vld [vmem:[%s2655_s22 + $0x50] sm:$0xff] (!%p542_p9) }
  0x44   : > { %2075 = vmatpush3.bf16.msra.mxu0 %v949_v14  ;;  %2062 = vmatprep.mubr.msk.bf16.mxu0 %vm647_vm1, %v613_v15  ;;  %v637_v28 = vpack.c.bf16 %v1851_v24, %v1850_v23  ;;  %v638_v29 = vpack.c.bf16 %v1853_v26, %v1852_v25  ;;  %v2275_v30 = vld [vmem:[%s2928_s3 + $0x8] sm:$0xff]   ;;  %v606_v31 = vld [vmem:[%s2655_s22 + $0x58] sm:$0xff]  ;;  %v1854_v32 = vld [vmem:[%s2655_s22 + $0xa0] sm:$0xff]  ;;  %s2946_s27 = smov (!%p585_p10, %s2392_s27), 1  ;;  %s2948_s10 = smov (!%p587_p11, %s1847_s10), 31 }
  0x45   : > { %2217 = vmatprep.subr.msk.bf16.mxu0 %vm672_vm0, %v2671_v16  ;;  %v1855_v33 = vld [vmem:[%s2655_s22 + $0xa8] sm:$0xff]  ;;  %v607_v34 = vld [vmem:[%s2655_s22 + $0x60] sm:$0xff]  ;;  %v616_v37 = vpack.c.bf16 %v606_v31, %v605_v27  ;;  %v1856_v38 = vld [vmem:[%s2655_s22 + $0xb0] sm:$0xff]  ;;  %s1848_s26 = sshll.u32 %s2946_s27, 5 }
  0x46   : > { %v608_v35 = vld [vmem:[%s2655_s22 + $0x68] sm:$0xff]  ;;  %2040 = vmatprep.mubr.msk.bf16.mxu1 %vm647_vm1, %v637_v28  ;;  %v639_v36 = vpack.c.bf16 %v1855_v33, %v1854_v32  ;;  %v1857_v39 = vld [vmem:[%s2655_s22 + $0xb8] sm:$0xff]  ;;  %v1858_v41 = vld [vmem:[%s2655_s22 + $0xc0] sm:$0xff]  ;;  %s590_s11 = sadd.s32 %s1848_s26, %s2948_s10 }
  0x47   : > { %2041 = vmatmul.mubr.msk.bf16.vlgmr.msra.gmra.mrb[0].mxu1 %vm647_vm1, %v638_v29  ;;  %v617_v40 = vpack.c.bf16 %v608_v35, %v607_v34  ;;  %v1859_v42 = vld [vmem:[%s2655_s22 + $0xc8] sm:$0xff]  ;;  %v640_v43 = vpack.c.bf16 %v1857_v39, %v1856_v38  ;;  %v609_v44 = vld [vmem:[%s2655_s22 + $0x70] sm:$0xff]  ;;  %v610_v45 = vld [vmem:[%s2655_s22 + $0x78] sm:$0xff]  ;;  %s1849_s27 = sshll.u32 %s590_s11, 3 }
  0x48   : > { %2044 = vmatprep.mubr.msk.bf16.mxu1 %vm647_vm1, %v639_v36  ;;  %2111 = vmatpush3.bf16.msra.mxu1 %v2274_v3  ;;  %v1883_v46 = vld [vmem:[%s2655_s22 + $0x100] sm:$0xff]  ;;  %v641_v47 = vpack.c.bf16 %v1859_v42, %v1858_v41  ;;  %v1884_v48 = vld [vmem:[%s2655_s22 + $0x108] sm:$0xff]  ;;  %v1860_v49 = vld [vmem:[%s2655_s22 + $0xd0] sm:$0xff]  ;;  %v618_v54 = vpack.c.bf16 %v610_v45, %v609_v44  ;;  %s2867_s15 = scalar_lea.vmem %s2932_s7, %s1849_s27 }
  0x49   : > { %2112 = vmatprep.subr.bf16.mxu1 %v2275_v30  ;;  %v1861_v50 = vld [vmem:[%s2655_s22 + $0xd8] sm:$0xff]  ;;  %v1862_v51 = vld [vmem:[%s2655_s22 + $0xe0] sm:$0xff]  ;;  %v1863_v52 = vld [vmem:[%s2655_s22 + $0xe8] sm:$0xff]  ;;  %v914_v55 = vpack.c.bf16 %v1884_v48, %v1883_v46 }
  0x4a   : > { %v1885_v56 = vld [vmem:[%s2655_s22 + $0x110] sm:$0xff]  ;;  %v642_v57 = vpack.c.bf16 %v1861_v50, %v1860_v49  ;;  %v643_v58 = vpack.c.bf16 %v1863_v52, %v1862_v51  ;;  %v1886_v59 = vld [vmem:[%s2655_s22 + $0x118] sm:$0xff]  ;;  %v1887_v60 = vld [vmem:[%s2655_s22 + $0x120] sm:$0xff] }
  0x4b   : > { %2063 = vmatmul.mubr.msk.bf16.gmra.mrb[4].mxu0 %vm647_vm1, %v614_v21  ;;  %v1888_v61 = vld [vmem:[%s2655_s22 + $0x128] sm:$0xff]  ;;  %v915_v62 = vpack.c.bf16 %v1886_v59, %v1885_v56  ;;  %v1864_v63 = vld [vmem:[%s2655_s22 + $0xf0] sm:$0xff]  ;;  %v1865_v0 = vld [vmem:[%s2655_s22 + $0xf8] sm:$0xff] }
  0x4c   : > { %2066 = vmatprep.mubr.msk.bf16.mxu0 %vm647_vm1, %v615_v22  ;;  %2113 = vmatpush3.bf16.msra.mxu1 %v2275_v30  ;;  %v916_v1 = vpack.c.bf16 %v1888_v61, %v1887_v60  ;;  %v644_v3 = vpack.c.bf16 %v1865_v0, %v1864_v63  ;;  %v1889_v4 = vld [vmem:[%s2655_s22 + $0x130] sm:$0xff]  ;;  %v1890_v5 = vld [vmem:[%s2655_s22 + $0x138] sm:$0xff]  ;;  %v1891_v6 = vld [vmem:[%s2655_s22 + $0x140] sm:$0xff] }
  0x4d   : > { %2114 = vmatprep.subr.bf16.mxu1 %v2276_v53  ;;  %v1892_v7 = vld [vmem:[%s2655_s22 + $0x148] sm:$0xff]  ;;  %v917_v8 = vpack.c.bf16 %v1890_v5, %v1889_v4  ;;  %v1893_v10 = vld [vmem:[%s2655_s22 + $0x150] sm:$0xff]  ;;  %v1894_v11 = vld [vmem:[%s2655_s22 + $0x158] sm:$0xff] }
  0x4e   : > { %v918_v9 = vpack.c.bf16 %v1892_v7, %v1891_v6  ;;  %v1895_v12 = vld [vmem:[%s2655_s22 + $0x160] sm:$0xff]  ;;  %v1896_v13 = vld [vmem:[%s2655_s22 + $0x168] sm:$0xff]  ;;  %v919_v14 = vpack.c.bf16 %v1894_v11, %v1893_v10  ;;  %v1897_v16 = vld [vmem:[%s2655_s22 + $0x170] sm:$0xff] }
  0x4f   : > { %2045 = vmatmul.mubr.msk.bf16.gmra.mrb[4].mxu1 %vm647_vm1, %v640_v43  ;;  %v920_v15 = vpack.c.bf16 %v1896_v13, %v1895_v12  ;;  %v1898_v17 = vld [vmem:[%s2655_s22 + $0x178] sm:$0xff]  ;;  %v1908_v18 = vld [vmem:[%s2655_s22 + $0x180] sm:$0xff]  ;;  %v1909_v19 = vld [vmem:[%s2655_s22 + $0x188] sm:$0xff] }
  0x50   : > { %2048 = vmatprep.mubr.msk.bf16.mxu1 %vm647_vm1, %v641_v47  ;;  %2115 = vmatpush3.bf16.msra.mxu1 %v2276_v53  ;;  %v921_v20 = vpack.c.bf16 %v1898_v17, %v1897_v16  ;;  %v1081_v21 = vpack.c.bf16 %v1909_v19, %v1908_v18  ;;  %v1910_v22 = vld [vmem:[%s2655_s22 + $0x190] sm:$0xff]  ;;  %v1911_v23 = vld [vmem:[%s2655_s22 + $0x198] sm:$0xff]  ;;  %v1912_v24 = vld [vmem:[%s2655_s22 + $0x1a0] sm:$0xff] }
  0x51   : > { %v1913_v25 = vld [vmem:[%s2655_s22 + $0x1a8] sm:$0xff]  ;;  %v1082_v26 = vpack.c.bf16 %v1911_v23, %v1910_v22  ;;  %v1914_v28 = vld [vmem:[%s2655_s22 + $0x1b0] sm:$0xff]  ;;  %v1915_v29 = vld [vmem:[%s2655_s22 + $0x1b8] sm:$0xff] }
  0x52   : > { %v1083_v27 = vpack.c.bf16 %v1913_v25, %v1912_v24  ;;  %v1916_v30 = vld [vmem:[%s2655_s22 + $0x1c0] sm:$0xff]  ;;  %v1917_v31 = vld [vmem:[%s2655_s22 + $0x1c8] sm:$0xff]  ;;  %v1084_v32 = vpack.c.bf16 %v1915_v29, %v1914_v28  ;;  %v1918_v34 = vld [vmem:[%s2655_s22 + $0x1d0] sm:$0xff] }
  0x53   : > { %2067 = vmatmul.mubr.msk.bf16.gmra.mrb[8].mxu0 %vm647_vm1, %v616_v37  ;;  %v1085_v33 = vpack.c.bf16 %v1917_v31, %v1916_v30  ;;  %v1919_v35 = vld [vmem:[%s2655_s22 + $0x1d8] sm:$0xff]  ;;  %v1920_v36 = vld [vmem:[%s2655_s22 + $0x1e0] sm:$0xff]  ;;  %v1921_v37 = vld [vmem:[%s2655_s22 + $0x1e8] sm:$0xff] }
  0x54   : > { %2070 = vmatprep.mubr.msk.bf16.mxu0 %vm647_vm1, %v617_v40  ;;  %v1086_v38 = vpack.c.bf16 %v1919_v35, %v1918_v34  ;;  %v1087_v39 = vpack.c.bf16 %v1921_v37, %v1920_v36  ;;  %v1922_v40 = vld [vmem:[%s2655_s22 + $0x1f0] sm:$0xff]  ;;  %v1923_v41 = vld [vmem:[%s2655_s22 + $0x1f8] sm:$0xff]  ;;  %v2278_v44 = vld [vmem:[%s2930_s5] sm:$0xff]  }
  0x55   : > { %v1088_v42 = vpack.c.bf16 %v1923_v41, %v1922_v40  ;;  %v2277_v43 = vld [vmem:[%s2928_s3 + $0x18] sm:$0xff]   ;;  %v2279_v24 = vld [vmem:[%s2930_s5 + $0x8] sm:$0xff]   ;;  %v2280_v31 = vld [vmem:[%s2930_s5 + $0x10] sm:$0xff]  }
  0x56   : > { %2116 = vmatprep.subr.bf16.mxu1 %v2277_v43 }
  0x57   : > { %2049 = vmatmul.mubr.msk.bf16.gmra.mrb[8].mxu1 %vm647_vm1, %v642_v57 }
  0x58   : > { %2052 = vmatprep.mubr.msk.bf16.mxu1 %vm647_vm1, %v643_v58  ;;  %2117 = vmatpush3.bf16.msra.mxu1 %v2277_v43 }
  0x59   : > { %2134 = vmatprep.subr.bf16.mxu1 %v2278_v44 }
  0x5b   : > { %2071 = vmatmul.mubr.msk.bf16.gmra.mrb[12].mxu0 %vm647_vm1, %v618_v54 }
  0x5c   : > { %2076 = vmatprep.mubr.msk.bf16.mxu0 %vm647_vm1, %v914_v55 }
  0x5f   : > { %2053 = vmatmul.mubr.msk.bf16.gmra.mrb[12].mxu1 %vm647_vm1, %v644_v3 }
  0x63   : > { %2077 = vmatmul.mubr.msk.bf16.vlgmr.msra.gmra.mrb[0].mxu0 %vm647_vm1, %v915_v62  ;;  %v2789_v62 = vld [vmem:[%s2927_s2] ss:$0 sm:$0xff] }
  0x64   : > { %2093 = vmatpush3.bf16.msra.mxu0 %v1116_v2  ;;  %2080 = vmatprep.mubr.msk.bf16.mxu0 %vm647_vm1, %v916_v1 }
  0x6b   : > { %2081 = vmatmul.mubr.msk.bf16.gmra.mrb[4].mxu0 %vm647_vm1, %v917_v8 }
  0x6c   : > { %2084 = vmatprep.mubr.msk.bf16.mxu0 %vm647_vm1, %v918_v9 }
  0x73   : > { %2085 = vmatmul.mubr.msk.bf16.gmra.mrb[8].mxu0 %vm647_vm1, %v919_v14 }
  0x74   : > { %2088 = vmatprep.mubr.msk.bf16.mxu0 %vm647_vm1, %v920_v15 }
  0x7b   : > { %2089 = vmatmul.mubr.msk.bf16.gmra.mrb[12].mxu0 %vm647_vm1, %v921_v20 }
  0x7c   : > { %2094 = vmatprep.mubr.msk.bf16.mxu0 %vm647_vm1, %v1081_v21 }
  0x83   : > { %2095 = vmatmul.mubr.msk.bf16.vlgmr.msra.gmra.mrb[0].mxu0 %vm647_vm1, %v1082_v26 }
  0x84   : > { %2098 = vmatprep.mubr.msk.bf16.mxu0 %vm647_vm1, %v1083_v27 }
  0x8b   : > { %2099 = vmatmul.mubr.msk.bf16.gmra.mrb[4].mxu0 %vm647_vm1, %v1084_v32 }
  0x8c   : > { %2102 = vmatprep.mubr.msk.bf16.mxu0 %vm647_vm1, %v1085_v33 }
  0x93   : > { %2103 = vmatmul.mubr.msk.bf16.gmra.mrb[8].mxu0 %vm647_vm1, %v1086_v38 }
  0x94   : > { %2106 = vmatprep.mubr.msk.bf16.mxu0 %vm647_vm1, %v1087_v39 }
  0x9b   : > { %2107 = vmatmul.mubr.msk.bf16.gmra.mrb[12].mxu0 %vm647_vm1, %v1088_v42 }
 0x11a   : > { %v2042_v45 = vpop.f32.mrb[0].mxu1 }
 0x11b   : > { %v710_v46 = vpop.f32.mrb[1].mxu1 }
 0x11c   : > { %v2043_v47 = vpop.f32.mrb[2].mxu1 }
 0x11d   : > { %v713_v48 = vpop.f32.mrb[3].mxu1 }
 0x122   : > { %v2046_v49 = vpop.f32.mrb[4].mxu1 }
 0x123   : > { %v726_v50 = vpop.f32.mrb[5].mxu1 }
 0x124   : > { %v2047_v51 = vpop.f32.mrb[6].mxu1 }
 0x125   : > { %v729_v52 = vpop.f32.mrb[7].mxu1 }
 0x12a   : > { %v2050_v53 = vpop.f32.mrb[8].mxu1 }
 0x12b   : > { %v742_v54 = vpop.f32.mrb[9].mxu1 }
 0x12c   : > { %v2051_v55 = vpop.f32.mrb[10].mxu1 }
 0x12d   : > { %v745_v56 = vpop.f32.mrb[11].mxu1 }
 0x132   : > { %v2778_v57 = vpop.f32.mrb[12].mxu1 }
 0x133   : > { %v2780_v58 = vpop.f32.mrb[13].mxu1 }
 0x134   : > { %v2782_v59 = vpop.f32.mrb[14].mxu1 }
 0x135   : > { %v2784_v60 = vpop.f32.mrb[15].mxu1 }
 0x156   : > { %v2096_v61 = vpop.f32.mrb[0].mxu0 }
 0x157   : > { %v2166_v63 = vadd.f32 %v2096_v61, %v2042_v45  ;;  %v1152_v0 = vpop.f32.mrb[1].mxu0 }
 0x158   : > { %v2167_v1 = vadd.f32 %v1152_v0, %v710_v46  ;;  %v2097_v2 = vpop.f32.mrb[2].mxu0 }
 0x159   : > { %v1240_v3 = vadd.f32 %v2166_v63, %v2789_v62  ;;  %v2168_v4 = vadd.f32 %v2097_v2, %v2043_v47  ;;  %v1155_v5 = vpop.f32.mrb[3].mxu0 }
 0x15a   : > { %v1238_v6 = vadd.f32 %v2167_v1, %v2789_v62  ;;  %v2169_v7 = vadd.f32 %v1155_v5, %v713_v48  ;;  %v2283_v5 = vld [vmem:[%s2930_s5 + $0x28] sm:$0xff]  }
 0x15b   : > { %v1241_v8 = vadd.f32 %v2168_v4, %v2789_v62  ;;  %v1256_v10 = vmax.f32 %v1240_v3, 0.0 }
 0x15c   : > { %v1239_v9 = vadd.f32 %v2169_v7, %v2789_v62  ;;  %v1254_v12 = vmax.f32 %v1238_v6, 0.0 }
 0x15d   : > { %v1257_v11 = vmax.f32 %v1241_v8, 0.0 }
 0x15e   : > { %v1255_v13 = vmax.f32 %v1239_v9, 0.0  ;;  %v2100_v14 = vpop.f32.mrb[4].mxu0 }
 0x15f   : > { %v1271_v15 = vpack.c.bf16 %v1257_v11, %v1256_v10  ;;  %v2170_v16 = vadd.f32 %v2100_v14, %v2046_v49  ;;  %v1168_v17 = vpop.f32.mrb[5].mxu0 }
 0x160   : > { %v1270_v18 = vpack.c.bf16 %v1255_v13, %v1254_v12  ;;  %v2171_v19 = vadd.f32 %v1168_v17, %v726_v50  ;;  %v2101_v20 = vpop.f32.mrb[6].mxu0  ;;  %v1934_v13 = vld [vmem:[%s2929_s4] ss:$0 sm:$0xff] }
 0x161   : > { %v1244_v21 = vadd.f32 %v2170_v16, %v2789_v62  ;;  %v2172_v22 = vadd.f32 %v2101_v20, %v2047_v51  ;;  %v1171_v23 = vpop.f32.mrb[7].mxu0  ;;  %v2282_v51 = vld [vmem:[%s2930_s5 + $0x20] sm:$0xff]  }
 0x162   : > { %v1242_v25 = vadd.f32 %v2171_v19, %v2789_v62  ;;  %v2173_v26 = vadd.f32 %v1171_v23, %v729_v52  ;;  %2118 = vmatprep.mubr.msk.bf16.mxu1 %vm1317_vm2, %v1270_v18 }
 0x163   : > { %v1245_v27 = vadd.f32 %v2172_v22, %v2789_v62  ;;  %2119 = vmatmul.mubr.msk.bf16.vlgmr.msra.gmra.mrb[16].mxu1 %vm1317_vm2, %v1271_v15  ;;  %v1260_v29 = vmax.f32 %v1244_v21, 0.0 }
 0x164   : > { %v1243_v28 = vadd.f32 %v2173_v26, %v2789_v62  ;;  %2135 = vmatpush3.bf16.msra.mxu1 %v2278_v44  ;;  %v1258_v32 = vmax.f32 %v1242_v25, 0.0  ;;  %v2281_v44 = vld [vmem:[%s2930_s5 + $0x18] sm:$0xff]  }
 0x165   : > { %v1261_v30 = vmax.f32 %v1245_v27, 0.0  ;;  %2136 = vmatprep.subr.bf16.mxu1 %v2279_v24 }
 0x166   : > { %v1259_v33 = vmax.f32 %v1243_v28, 0.0  ;;  %v2104_v34 = vpop.f32.mrb[8].mxu0 }
 0x167   : > { %v1273_v35 = vpack.c.bf16 %v1261_v30, %v1260_v29  ;;  %v2174_v36 = vadd.f32 %v2104_v34, %v2050_v53  ;;  %v1184_v37 = vpop.f32.mrb[9].mxu0 }
 0x168   : > { %v1272_v38 = vpack.c.bf16 %v1259_v33, %v1258_v32  ;;  %v2175_v39 = vadd.f32 %v1184_v37, %v742_v54  ;;  %v2105_v40 = vpop.f32.mrb[10].mxu0  ;;  %2137 = vmatpush3.bf16.msra.mxu1 %v2279_v24 }
 0x169   : > { %v1248_v41 = vadd.f32 %v2174_v36, %v2789_v62  ;;  %v2176_v42 = vadd.f32 %v2105_v40, %v2051_v55  ;;  %v1187_v43 = vpop.f32.mrb[11].mxu0  ;;  %2138 = vmatprep.subr.bf16.mxu1 %v2280_v31 }
 0x16a   : > { %v1246_v45 = vadd.f32 %v2175_v39, %v2789_v62  ;;  %v2177_v46 = vadd.f32 %v1187_v43, %v745_v56  ;;  %2122 = vmatprep.mubr.msk.bf16.mxu1 %vm1317_vm2, %v1272_v38 }
 0x16b   : > { %v1249_v47 = vadd.f32 %v2176_v42, %v2789_v62  ;;  %2123 = vmatmul.mubr.msk.bf16.gmra.mrb[20].mxu1 %vm1317_vm2, %v1273_v35  ;;  %v1264_v49 = vmax.f32 %v1248_v41, 0.0 }
 0x16c   : > { %v1247_v48 = vadd.f32 %v2177_v46, %v2789_v62  ;;  %2139 = vmatpush3.bf16.msra.mxu1 %v2280_v31  ;;  %v1262_v52 = vmax.f32 %v1246_v45, 0.0 }
 0x16d   : > { %v1265_v50 = vmax.f32 %v1249_v47, 0.0  ;;  %2140 = vmatprep.subr.bf16.mxu1 %v2281_v44 }
 0x16e   : > { %v1263_v53 = vmax.f32 %v1247_v48, 0.0  ;;  %v2108_v54 = vpop.f32.mrb[12].mxu0 }
 0x16f   : > { %v1275_v55 = vpack.c.bf16 %v1265_v50, %v1264_v49  ;;  %v2178_v56 = vadd.f32 %v2108_v54, %v2778_v57  ;;  %v1200_v61 = vpop.f32.mrb[13].mxu0 }
 0x170   : > { %v1274_v63 = vpack.c.bf16 %v1263_v53, %v1262_v52  ;;  %v2179_v0 = vadd.f32 %v1200_v61, %v2780_v58  ;;  %v2109_v1 = vpop.f32.mrb[14].mxu0  ;;  %2141 = vmatpush3.bf16.msra.mxu1 %v2281_v44 }
 0x171   : > { %v1252_v2 = vadd.f32 %v2178_v56, %v2789_v62  ;;  %v2180_v3 = vadd.f32 %v2109_v1, %v2782_v59  ;;  %v1203_v4 = vpop.f32.mrb[15].mxu0  ;;  %2142 = vmatprep.subr.bf16.mxu1 %v2282_v51 }
 0x172   : > { %v1250_v6 = vadd.f32 %v2179_v0, %v2789_v62  ;;  %v2181_v57 = vadd.f32 %v1203_v4, %v2784_v60  ;;  %2126 = vmatprep.mubr.msk.bf16.mxu1 %vm1317_vm2, %v1274_v63  ;;  %v2284_v60 = vld [vmem:[%s2930_s5 + $0x30] sm:$0xff]  }
 0x173   : > { %v1253_v58 = vadd.f32 %v2180_v3, %v2789_v62  ;;  %2127 = vmatmul.mubr.msk.bf16.gmra.mrb[24].mxu1 %vm1317_vm2, %v1275_v55  ;;  %v1268_v59 = vmax.f32 %v1252_v2, 0.0 }
 0x174   : > { %v1251_v7 = vadd.f32 %v2181_v57, %v2789_v62  ;;  %2143 = vmatpush3.bf16.msra.mxu1 %v2282_v51  ;;  %v1266_v9 = vmax.f32 %v1250_v6, 0.0  ;;  %v2285_v62 = vld [vmem:[%s2930_s5 + $0x38] sm:$0xff]  }
 0x175   : > { %v1269_v8 = vmax.f32 %v1253_v58, 0.0  ;;  %2144 = vmatprep.subr.bf16.mxu1 %v2283_v5 }
 0x176   : > { %v1267_v10 = vmax.f32 %v1251_v7, 0.0 }
 0x177   : > { %v1277_v11 = vpack.c.bf16 %v1269_v8, %v1268_v59  ;;  %v2846_v8 = vld [vmem:[%s2931_s6] ss:$0 sm:$0xff] }
 0x178   : > { %v1276_v12 = vpack.c.bf16 %v1267_v10, %v1266_v9  ;;  %2145 = vmatpush3.bf16.msra.mxu1 %v2283_v5 }
 0x179   : > { %2146 = vmatprep.subr.bf16.mxu1 %v2284_v60 }
 0x17a   : > { %2130 = vmatprep.mubr.msk.bf16.mxu1 %vm1317_vm2, %v1276_v12 }
 0x17b   : > { %2131 = vmatmul.mubr.msk.bf16.gmra.mrb[28].mxu1 %vm1317_vm2, %v1277_v11 }
 0x17c   : > { %2147 = vmatpush3.bf16.msra.mxu1 %v2284_v60 }
 0x17d   : > { %2148 = vmatprep.subr.bf16.mxu1 %v2285_v62 }
 0x180   : > { %2149 = vmatpush3.bf16.msra.mxu1 %v2285_v62 }
 0x236   : > { %v2120_v14 = vpop.f32.mrb[16].mxu1 }
 0x237   : > { %v1385_v15 = vadd.f32 %v2120_v14, %v1934_v13  ;;  %v1376_v16 = vpop.f32.mrb[17].mxu1 }
 0x238   : > { %v1377_v17 = vadd.f32 %v1934_v13, %v1376_v16  ;;  %v2121_v18 = vpop.f32.mrb[18].mxu1 }
 0x239   : > { %v1388_v19 = vadd.f32 %v2121_v18, %v1934_v13  ;;  %v1379_v20 = vpop.f32.mrb[19].mxu1  ;;  %v1441_v22 = vmax.f32 %v1385_v15, 0.0 }
 0x23a   : > { %v1380_v21 = vadd.f32 %v1934_v13, %v1379_v20  ;;  %v1439_v24 = vmax.f32 %v1377_v17, 0.0 }
 0x23b   : > { %v1442_v23 = vmax.f32 %v1388_v19, 0.0 }
 0x23c   : > { %v1440_v25 = vmax.f32 %v1380_v21, 0.0 }
 0x23d   : > { %v1456_v26 = vpack.c.bf16 %v1442_v23, %v1441_v22 }
 0x23e   : > { %v1455_v27 = vpack.c.bf16 %v1440_v25, %v1439_v24  ;;  %v2124_v28 = vpop.f32.mrb[20].mxu1 }
 0x23f   : > { %v1401_v29 = vadd.f32 %v2124_v28, %v1934_v13  ;;  %v1392_v30 = vpop.f32.mrb[21].mxu1 }
 0x240   : > { %v1393_v31 = vadd.f32 %v1934_v13, %v1392_v30  ;;  %v2125_v32 = vpop.f32.mrb[22].mxu1  ;;  %2150 = vmatprep.mubr.bf16.mxu1 %v1455_v27 }
 0x241   : > { %v1404_v33 = vadd.f32 %v2125_v32, %v1934_v13  ;;  %v1395_v34 = vpop.f32.mrb[23].mxu1  ;;  %2151 = vmatmul.mubr.bf16.vlgmr.msra.gmra.mrb[32].mxu1 %v1456_v26  ;;  %v1445_v36 = vmax.f32 %v1401_v29, 0.0 }
 0x242   : > { %v1396_v35 = vadd.f32 %v1934_v13, %v1395_v34  ;;  %v1443_v38 = vmax.f32 %v1393_v31, 0.0 }
 0x243   : > { %v1446_v37 = vmax.f32 %v1404_v33, 0.0 }
 0x244   : > { %v1444_v39 = vmax.f32 %v1396_v35, 0.0 }
 0x245   : > { %v1458_v40 = vpack.c.bf16 %v1446_v37, %v1445_v36 }
 0x246   : > { %v1457_v41 = vpack.c.bf16 %v1444_v39, %v1443_v38  ;;  %v2128_v42 = vpop.f32.mrb[24].mxu1 }
 0x247   : > { %v1417_v43 = vadd.f32 %v2128_v42, %v1934_v13  ;;  %v1408_v44 = vpop.f32.mrb[25].mxu1 }
 0x248   : > { %v1409_v45 = vadd.f32 %v1934_v13, %v1408_v44  ;;  %v2129_v46 = vpop.f32.mrb[26].mxu1  ;;  %2154 = vmatprep.mubr.bf16.mxu1 %v1457_v41 }
 0x249   : > { %v1420_v47 = vadd.f32 %v2129_v46, %v1934_v13  ;;  %v1411_v48 = vpop.f32.mrb[27].mxu1  ;;  %2155 = vmatmul.mubr.bf16.gmra.mrb[36].mxu1 %v1458_v40  ;;  %v1449_v50 = vmax.f32 %v1417_v43, 0.0 }
 0x24a   : > { %v1412_v49 = vadd.f32 %v1934_v13, %v1411_v48  ;;  %v1447_v52 = vmax.f32 %v1409_v45, 0.0 }
 0x24b   : > { %v1450_v51 = vmax.f32 %v1420_v47, 0.0 }
 0x24c   : > { %v1448_v53 = vmax.f32 %v1412_v49, 0.0 }
 0x24d   : > { %v1460_v54 = vpack.c.bf16 %v1450_v51, %v1449_v50 }
 0x24e   : > { %v1459_v55 = vpack.c.bf16 %v1448_v53, %v1447_v52  ;;  %v2132_v56 = vpop.f32.mrb[28].mxu1 }
 0x24f   : > { %v1433_v61 = vadd.f32 %v2132_v56, %v1934_v13  ;;  %v1424_v63 = vpop.f32.mrb[29].mxu1 }
 0x250   : > { %v1425_v0 = vadd.f32 %v1934_v13, %v1424_v63  ;;  %v2133_v1 = vpop.f32.mrb[30].mxu1  ;;  %2158 = vmatprep.mubr.bf16.mxu1 %v1459_v55 }
 0x251   : > { %v1436_v2 = vadd.f32 %v2133_v1, %v1934_v13  ;;  %v1427_v3 = vpop.f32.mrb[31].mxu1  ;;  %2159 = vmatmul.mubr.bf16.gmra.mrb[40].mxu1 %v1460_v54  ;;  %v1453_v5 = vmax.f32 %v1433_v61, 0.0 }
 0x252   : > { %v1428_v4 = vadd.f32 %v1934_v13, %v1427_v3  ;;  %v1451_v57 = vmax.f32 %v1425_v0, 0.0 }
 0x253   : > { %v1454_v6 = vmax.f32 %v1436_v2, 0.0 }
 0x254   : > { %v1452_v58 = vmax.f32 %v1428_v4, 0.0 }
 0x255   : > { %v1462_v7 = vpack.c.bf16 %v1454_v6, %v1453_v5 }
 0x256   : > { %v1461_v59 = vpack.c.bf16 %v1452_v58, %v1451_v57 }
 0x258   : > { %2162 = vmatprep.mubr.bf16.mxu1 %v1461_v59 }
 0x259   : > { %2163 = vmatmul.mubr.bf16.gmra.mrb[44].mxu1 %v1462_v7 }
 0x314   : > { %v2152_v9 = vpop.f32.mrb[32].mxu1 }
 0x315   : > { %v1577_v10 = vadd.f32 %v2152_v9, %v2846_v8  ;;  %v1568_v11 = vpop.f32.mrb[33].mxu1 }
 0x316   : > { %v1569_v12 = vadd.f32 %v2846_v8, %v1568_v11  ;;  %v2153_v60 = vpop.f32.mrb[34].mxu1 }
 0x317   : > { %v1958_v62 = vmul.f32 -1.442695, %v1577_v10  ;;  %v1580_v13 = vadd.f32 %v2153_v60, %v2846_v8  ;;  %v1571_v14 = vpop.f32.mrb[35].mxu1 }
 0x318   : > { %v1956_v15 = vmul.f32 -1.442695, %v1569_v12  ;;  %v1572_v16 = vadd.f32 %v2846_v8, %v1571_v14 }
 0x319   : > { %2286 = vpow2.f32 %v1958_v62  ;;  %v1959_v17 = vmul.f32 -1.442695, %v1580_v13 }
 0x31a   : > { %2288 = vpow2.f32 %v1956_v15  ;;  %v1957_v18 = vmul.f32 -1.442695, %v1572_v16 }
 0x31b   : > { %2290 = vpow2.f32 %v1959_v17 }
 0x31c   : > { %2292 = vpow2.f32 %v1957_v18  ;;  %v2156_v19 = vpop.f32.mrb[36].mxu1 }
 0x31d   : > { %v1593_v20 = vadd.f32 %v2156_v19, %v2846_v8  ;;  %v1584_v21 = vpop.f32.mrb[37].mxu1 }
 0x31e   : > { %v1585_v22 = vadd.f32 %v2846_v8, %v1584_v21  ;;  %v2157_v23 = vpop.f32.mrb[38].mxu1 }
 0x31f   : > { %v1962_v24 = vmul.f32 -1.442695, %v1593_v20  ;;  %v1596_v25 = vadd.f32 %v2157_v23, %v2846_v8  ;;  %v1587_v26 = vpop.f32.mrb[39].mxu1 }
 0x320   : > { %v1960_v27 = vmul.f32 -1.442695, %v1585_v22  ;;  %v1588_v28 = vadd.f32 %v2846_v8, %v1587_v26 }
 0x321   : > { %2294 = vpow2.f32 %v1962_v24  ;;  %v1963_v29 = vmul.f32 -1.442695, %v1596_v25 }
 0x322   : > { %2296 = vpow2.f32 %v1960_v27  ;;  %v1961_v30 = vmul.f32 -1.442695, %v1588_v28 }
 0x323   : > { %v2287_v31 = vpop.eup %2286  ;;  %2298 = vpow2.f32 %v1963_v29 }
 0x324   : > { %v2289_v32 = vpop.eup %2288  ;;  %v1681_v33 = vadd.f32 1.0, %v2287_v31  ;;  %2300 = vpow2.f32 %v1961_v30  ;;  %v2160_v34 = vpop.f32.mrb[40].mxu1 }
 0x325   : > { %v2291_v35 = vpop.eup %2290  ;;  %v1679_v36 = vadd.f32 1.0, %v2289_v32  ;;  %v1609_v37 = vadd.f32 %v2160_v34, %v2846_v8  ;;  %v1600_v38 = vpop.f32.mrb[41].mxu1 }
 0x326   : > { %v2293_v39 = vpop.eup %2292  ;;  %2302 = vrcp.f32 %v1681_v33  ;;  %v1682_v40 = vadd.f32 1.0, %v2291_v35  ;;  %v1601_v41 = vadd.f32 %v2846_v8, %v1600_v38  ;;  %v2161_v42 = vpop.f32.mrb[42].mxu1 }
 0x327   : > { %2304 = vrcp.f32 %v1679_v36  ;;  %v1680_v43 = vadd.f32 1.0, %v2293_v39  ;;  %v1966_v44 = vmul.f32 -1.442695, %v1609_v37  ;;  %v1612_v45 = vadd.f32 %v2161_v42, %v2846_v8  ;;  %v1603_v46 = vpop.f32.mrb[43].mxu1 }
 0x328   : > { %2306 = vrcp.f32 %v1682_v40  ;;  %v1964_v47 = vmul.f32 -1.442695, %v1601_v41  ;;  %v1604_v48 = vadd.f32 %v2846_v8, %v1603_v46 }
 0x329   : > { %2308 = vrcp.f32 %v1680_v43  ;;  %v1967_v49 = vmul.f32 -1.442695, %v1612_v45 }
 0x32a   : > { %2310 = vpow2.f32 %v1966_v44  ;;  %v1965_v50 = vmul.f32 -1.442695, %v1604_v48 }
 0x32b   : > { %v2295_v51 = vpop.eup %2294  ;;  %2312 = vpow2.f32 %v1964_v47 }
 0x32c   : > { %v2297_v52 = vpop.eup %2296  ;;  %v1685_v53 = vadd.f32 1.0, %v2295_v51  ;;  %2314 = vpow2.f32 %v1967_v49  ;;  %v2164_v54 = vpop.f32.mrb[44].mxu1 }
 0x32d   : > { %v2299_v55 = vpop.eup %2298  ;;  %v1683_v56 = vadd.f32 1.0, %v2297_v52  ;;  %2316 = vpow2.f32 %v1965_v50  ;;  %v1625_v61 = vadd.f32 %v2164_v54, %v2846_v8  ;;  %v1616_v63 = vpop.f32.mrb[45].mxu1 }
 0x32e   : > { %v2301_v0 = vpop.eup %2300  ;;  %2318 = vrcp.f32 %v1685_v53  ;;  %v1686_v1 = vadd.f32 1.0, %v2299_v55  ;;  %v1617_v2 = vadd.f32 %v2846_v8, %v1616_v63  ;;  %v2165_v3 = vpop.f32.mrb[46].mxu1 }
 0x32f   : > { %2320 = vrcp.f32 %v1683_v56  ;;  %v1684_v4 = vadd.f32 1.0, %v2301_v0  ;;  %v1970_v5 = vmul.f32 -1.442695, %v1625_v61  ;;  %v1628_v6 = vadd.f32 %v2165_v3, %v2846_v8  ;;  %v1619_v57 = vpop.f32.mrb[47].mxu1 }
 0x330   : > { %v2303_v58 = vpop.eup %2302  ;;  %2322 = vrcp.f32 %v1686_v1  ;;  %v1968_v7 = vmul.f32 -1.442695, %v1617_v2  ;;  %v1620_v59 = vadd.f32 %v2846_v8, %v1619_v57 }
 0x331   : > { %v2305_v9 = vpop.eup %2304  ;;  %1730 = vst.msk [vmem:[%s2867_s15 + $0x10] sm:$0xff] %vm1727_vm3, %v2303_v58  ;;  %2324 = vrcp.f32 %v1684_v4  ;;  %v1971_v10 = vmul.f32 -1.442695, %v1628_v6 }
 0x332   : > { %v2307_v11 = vpop.eup %2306  ;;  %1728 = vst.msk [vmem:[%s2867_s15] sm:$0xff] %vm1727_vm3, %v2305_v9  ;;  %2326 = vpow2.f32 %v1970_v5  ;;  %v1969_v12 = vmul.f32 -1.442695, %v1620_v59 }
 0x333   : > { %v2309_v60 = vpop.eup %2308  ;;  %1731 = vst.msk [vmem:[%s2867_s15 + $0x18] sm:$0xff] %vm1727_vm3, %v2307_v11  ;;  %2328 = vpow2.f32 %v1968_v7 }
 0x334   : > { %v2311_v62 = vpop.eup %2310  ;;  %1729 = vst.msk [vmem:[%s2867_s15 + $0x8] sm:$0xff] %vm1727_vm3, %v2309_v60  ;;  %2330 = vpow2.f32 %v1971_v10 }
 0x335   : > { %v2313_v8 = vpop.eup %2312  ;;  %v1689_v13 = vadd.f32 1.0, %v2311_v62  ;;  %2332 = vpow2.f32 %v1969_v12 }
 0x336   : > { %v2315_v14 = vpop.eup %2314  ;;  %v1687_v15 = vadd.f32 1.0, %v2313_v8 }
 0x337   : > { %v2317_v16 = vpop.eup %2316  ;;  %2334 = vrcp.f32 %v1689_v13  ;;  %v1690_v17 = vadd.f32 1.0, %v2315_v14 }
 0x338   : > { %v2319_v18 = vpop.eup %2318  ;;  %2336 = vrcp.f32 %v1687_v15  ;;  %v1688_v19 = vadd.f32 1.0, %v2317_v16 }
 0x339   : > { %v2321_v20 = vpop.eup %2320  ;;  %1734 = vst.msk [vmem:[%s2867_s15 + $0x30] sm:$0xff] %vm1727_vm3, %v2319_v18  ;;  %2338 = vrcp.f32 %v1690_v17 }
 0x33a   : > { %v2323_v21 = vpop.eup %2322  ;;  %1732 = vst.msk [vmem:[%s2867_s15 + $0x20] sm:$0xff] %vm1727_vm3, %v2321_v20  ;;  %2340 = vrcp.f32 %v1688_v19 }
 0x33b   : > { %v2325_v22 = vpop.eup %2324  ;;  %1735 = vst.msk [vmem:[%s2867_s15 + $0x38] sm:$0xff] %vm1727_vm3, %v2323_v21 }
 0x33c   : > { %v2327_v23 = vpop.eup %2326  ;;  %1733 = vst.msk [vmem:[%s2867_s15 + $0x28] sm:$0xff] %vm1727_vm3, %v2325_v22 }
 0x33d   : > { %v2329_v24 = vpop.eup %2328  ;;  %v1693_v25 = vadd.f32 1.0, %v2327_v23 }
 0x33e   : > { %v2331_v26 = vpop.eup %2330  ;;  %v1691_v27 = vadd.f32 1.0, %v2329_v24 }
 0x33f   : > { %v2333_v28 = vpop.eup %2332  ;;  %2342 = vrcp.f32 %v1693_v25  ;;  %v1694_v29 = vadd.f32 1.0, %v2331_v26 }
 0x340   : > { %2344 = vrcp.f32 %v1691_v27  ;;  %v1692_v30 = vadd.f32 1.0, %v2333_v28 }
 0x341   : > { %v2335_v31 = vpop.eup %2334  ;;  %2346 = vrcp.f32 %v1694_v29 }
 0x342   : > { %v2337_v32 = vpop.eup %2336  ;;  %1738 = vst.msk [vmem:[%s2867_s15 + $0x50] sm:$0xff] %vm1727_vm3, %v2335_v31  ;;  %2348 = vrcp.f32 %v1692_v30 }
 0x343   : > { %v2339_v33 = vpop.eup %2338  ;;  %1736 = vst.msk [vmem:[%s2867_s15 + $0x40] sm:$0xff] %vm1727_vm3, %v2337_v32 }
 0x344   : > { %v2341_v34 = vpop.eup %2340  ;;  %1739 = vst.msk [vmem:[%s2867_s15 + $0x58] sm:$0xff] %vm1727_vm3, %v2339_v33 }
 0x345   : > { %1737 = vst.msk [vmem:[%s2867_s15 + $0x48] sm:$0xff] %vm1727_vm3, %v2341_v34 }
 0x349   : > { %v2343_v35 = vpop.eup %2342 }
 0x34a   : > { %v2345_v36 = vpop.eup %2344  ;;  %1742 = vst.msk [vmem:[%s2867_s15 + $0x70] sm:$0xff] %vm1727_vm3, %v2343_v35 }
 0x34b   : > { %v2347_v37 = vpop.eup %2346  ;;  %1740 = vst.msk [vmem:[%s2867_s15 + $0x60] sm:$0xff] %vm1727_vm3, %v2345_v36 }
 0x34c   : > { %v2349_v38 = vpop.eup %2348  ;;  %1743 = vst.msk [vmem:[%s2867_s15 + $0x78] sm:$0xff] %vm1727_vm3, %v2347_v37 }
 0x34d   : > { %1741 = vst.msk [vmem:[%s2867_s15 + $0x68] sm:$0xff] %vm1727_vm3, %v2349_v38 }
 0x34e PF: > { %s17_s30 = sadd.s32 1, %s2404_s30   ;;  %s2933_s24 = smov %s2384_s25 }
 0x34f   : > { %p14_p12 = scmp.ge.s32.totalorder %s17_s30, 6   ;;  %s2934_s25 = smov %s2497_s14 }
 0x350   : > { %s2935_s26 = smov %s2396_s28  ;;  %s2936_s27 = smov %s2400_s29 }
 0x351   : > { %s2937_s28 = smov %s2940_s8  ;;  %s2938_s29 = smov %s2944_s9 }
 0x352   :  { %16 = sbr.rel (!%p14_p12) target bundleno = 4 (0x4), region = 127 }

</bundles_post_ra>
